<compile_context>
chip_gen: v7x
topology: tpu7x:2x2x1
jax: 0.10.0
libtpu: 0.0.40
codegen_flags: <defaults>
</compile_context>

<pallas_src>
import jax
import jax.numpy as jnp
from jax import lax
from jax.experimental import pallas as pl
from jax.experimental.pallas import tpu as pltpu

# Above the 16/32 MiB scoped defaults, safely below v7x's 64 MiB physical VMEM.
_VMEM_LIMIT = 48 * 1024 * 1024


# ----------------------------------------------------------------------------
# tiling helpers
# ----------------------------------------------------------------------------
def _round_up(x, m):
    return ((x + m - 1) // m) * m


def _is_megacore():
    """True only for chips with 2 TensorCores sharing one device (v7x)."""
    try:
        kind = jax.devices()[0].device_kind.lower()
    except Exception:
        return False
    return "v7" in kind


def _row_tile(m, cap=512):
    """Row tile for the (T*B, Hp) projection matmul."""
    if m <= cap:
        return m
    for tm in (512, 256):
        if m % tm == 0:
            return tm
    return 256  # non-divisible M: pl.cdiv grid with a masked tail block


def _batch_tile(b, megacore):
    """Batch tile for kernel 2's 'parallel' grid axis.

    Single-TC chips (v5e/v6e): never split -- splitting only halves the M dim
    of every recurrence matmul and doubles the serial grid steps.  v7x: split
    into exactly 2 sublane-aligned tiles so the axis shards across its 2 TCs.
    """
    if megacore and b % 16 == 0:
        return b // 2
    return b


def _time_chunk(t, bt, hp, itemsize, cap=32, budget=16 << 20):
    """Timesteps unrolled per serial grid step of kernel 2.

    Bigger chunks amortize the ~0.35us per-grid-step overhead on the serial
    time axis; bounded so 2 directions x 2 pipeline buffers of (tt, bt, 3*hp)
    gate inputs stay within the VMEM budget.
    """
    best = 1
    for tt in range(1, min(cap, t) + 1):
        if t % tt == 0 and 4 * tt * bt * 3 * hp * itemsize <= budget:
            best = tt
    return best


# ----------------------------------------------------------------------------
# kernel 1: fused input projection  gi = x @ [W_ih_f | W_ih_b] + [b_f | b_b]
# ----------------------------------------------------------------------------
def _input_proj_kernel(x_ref, w_ref, b_ref, gi_ref):
    gi_ref[...] = (jnp.dot(x_ref[...], w_ref[...],
                           preferred_element_type=jnp.float32)
                   + b_ref[...]).astype(gi_ref.dtype)


# ----------------------------------------------------------------------------
# kernel 2: fused bidirectional GRU recurrence + classifier epilogue
# ----------------------------------------------------------------------------
def _bigru_recurrence_kernel(gif_ref, gib_ref,
                             whf_ref, bhf_ref, whb_ref, bhb_ref,
                             wff_ref, wfb_ref, bfc_ref,
                             out_ref, hf_ref, hb_ref):
    tc = pl.program_id(1)
    ntc = pl.num_programs(1)
    TT = gif_ref.shape[0]
    Bt, Hp = hf_ref.shape

    @pl.when(tc == 0)
    def _init():
        hf_ref[...] = jnp.zeros_like(hf_ref)
        hb_ref[...] = jnp.zeros_like(hb_ref)

    # Hoist weight loads / bias broadcasts out of the time loop
    # (JAX does not CSE broadcast_in_dim).
    whf = whf_ref[...]
    whb = whb_ref[...]
    bhf = jnp.broadcast_to(bhf_ref[...], (Bt, 3 * Hp))
    bhb = jnp.broadcast_to(bhb_ref[...], (Bt, 3 * Hp))

    def gru_step(gi, h, w_hh, b_hh):
        # PyTorch GRU cell, gate order [r, z, n]; gi already holds x@W_ih+b_ih.
        gh = jnp.dot(h.astype(w_hh.dtype), w_hh,
                     preferred_element_type=jnp.float32) + b_hh
        r = jax.nn.sigmoid(gi[:, 0:Hp] + gh[:, 0:Hp])
        z = jax.nn.sigmoid(gi[:, Hp:2 * Hp] + gh[:, Hp:2 * Hp])
        n = jnp.tanh(gi[:, 2 * Hp:3 * Hp] + r * gh[:, 2 * Hp:3 * Hp])
        return (1.0 - z) * n + z * h

    def body(i, carry):
        hf, hb = carry
        # Fused fwd/bwd: forward time tc*TT + i, backward time T-1-(tc*TT+i)
        # (== in-chunk index TT-1-i of the reversed chunk).  Independent
        # directions -> their h @ W_hh matmuls overlap on the MXU.
        hf = gru_step(gif_ref[i], hf, whf, bhf)
        hb = gru_step(gib_ref[TT - 1 - i], hb, whb, bhb)
        return hf, hb

    hf, hb = lax.fori_loop(0, TT, body, (hf_ref[...], hb_ref[...]),
                           unroll=True)
    hf_ref[...] = hf
    hb_ref[...] = hb

    @pl.when(tc == ntc - 1)
    def _epilogue():
        # torch: cat([hidden[-1], hidden[-2]]) = [backward, forward], then fc.
        # Split-FC form avoids the concat/relayout entirely.
        out = (jnp.dot(hb.astype(wfb_ref.dtype), wfb_ref[...],
                       preferred_element_type=jnp.float32)
               + jnp.dot(hf.astype(wff_ref.dtype), wff_ref[...],
                         preferred_element_type=jnp.float32)
               + bfc_ref[...])
        out_ref[...] = out.astype(out_ref.dtype)


# ----------------------------------------------------------------------------
# wrapper
# ----------------------------------------------------------------------------
def rnn_classifier_forward(params, tokens, seq_lengths,
                           compute_dtype=jnp.float32):
    """Forward pass of RNNClassifier.

    tokens: (batch, seq_len) int32.  seq_lengths is accepted but unused,
    exactly like the reference forward (it never packs the padded sequence).
    compute_dtype=bf16 is valid on all generations (v5e/v6e/v7x MXU take bf16;
    gate math / accumulation stay f32), halving x/gi/weight HBM traffic.
    """
    del seq_lengths
    emb = params["embedding"]
    H = emb.shape[1]
    B, T = tokens.shape
    O = params["b_fc"].shape[1]
    cd = compute_dtype

    # --- lane alignment: pad hidden and output widths to multiples of 128 ---
    # Padding is exact: padded weight rows/cols and biases are zero, so padded
    # hidden units stay identically zero and real outputs are unchanged.
    Hp = _round_up(H, 128)
    Op = _round_up(O, 128)

    def pad_gru_w(w):  # (H, 3H) gate-blocked [r|z|n] -> (Hp, 3Hp)
        wg = jnp.pad(w.reshape(H, 3, H), ((0, Hp - H), (0, 0), (0, Hp - H)))
        return wg.reshape(Hp, 3 * Hp).astype(cd)

    def pad_gru_b(b):  # (1, 3H) -> (1, 3Hp), kept f32 (added to f32 acc)
        bg = jnp.pad(b.reshape(1, 3, H), ((0, 0), (0, 0), (0, Hp - H)))
        return bg.reshape(1, 3 * Hp).astype(jnp.float32)

    emb_p = jnp.pad(emb, ((0, 0), (0, Hp - H))).astype(cd)  # cast table once

    # Fused per-direction input-projection weights: (Hp, 6Hp) / (1, 6Hp).
    w_ih_cat = jnp.concatenate([pad_gru_w(params["w_ih_f"]),
                                pad_gru_w(params["w_ih_b"])], axis=1)
    b_ih_cat = jnp.concatenate([pad_gru_b(params["b_ih_f"]),
                                pad_gru_b(params["b_ih_b"])], axis=1)
    w_hh_f = pad_gru_w(params["w_hh_f"])
    w_hh_b = pad_gru_w(params["w_hh_b"])
    b_hh_f = pad_gru_b(params["b_hh_f"])
    b_hh_b = pad_gru_b(params["b_hh_b"])

    w_fc = params["w_fc"]
    w_fc_bwd = jnp.pad(w_fc[:H], ((0, Hp - H), (0, Op - O))).astype(cd)  # hidden[-1]
    w_fc_fwd = jnp.pad(w_fc[H:], ((0, Hp - H), (0, Op - O))).astype(cd)  # hidden[-2]
    b_fc = jnp.pad(params["b_fc"], ((0, 0), (0, Op - O))).astype(jnp.float32)

    # --- embedding gather (plain-JAX glue), time-major like input.t() -------
    x2 = emb_p[tokens.T].reshape(T * B, Hp)            # (T*B, Hp), compute dtype

    # --- kernel 1: one fused input-projection matmul (both directions) ------
    M = T * B
    N6 = 6 * Hp
    tm = _row_tile(M)
    tn = N6 if N6 <= 4096 else 2048                    # N-tile for big H (v7x VMEM)
    grid_m = pl.cdiv(M, tm)
    grid_n = pl.cdiv(N6, tn)

    gi = pl.pallas_call(
        _input_proj_kernel,
        out_shape=jax.ShapeDtypeStruct((M, N6), cd),   # gi stored in compute dtype
        grid=(grid_m, grid_n),
        in_specs=[
            pl.BlockSpec((tm, Hp), lambda m, n: (m, 0)),    # x rows (streamed)
            pl.BlockSpec((Hp, tn), lambda m, n: (0, n)),    # fused W_ih
            pl.BlockSpec((1, tn), lambda m, n: (0, n)),     # fused b_ih
        ],
        out_specs=pl.BlockSpec((tm, tn), lambda m, n: (m, n)),
        compiler_params=pltpu.CompilerParams(
            dimension_semantics=("parallel", "parallel"),
            vmem_limit_bytes=_VMEM_LIMIT),
    )(x2, w_ih_cat, b_ih_cat)

    gi = gi.reshape(T, B, N6)                          # free row-major split

    # --- kernel 2: fused bidirectional recurrence + fc ----------------------
    megacore = _is_megacore()
    bt = _batch_tile(B, megacore)
    nb = B // bt
    tt = _time_chunk(T, bt, Hp, jnp.dtype(cd).itemsize)
    ntc = T // tt

    out_full = pl.pallas_call(
        _bigru_recurrence_kernel,
        out_shape=jax.ShapeDtypeStruct((B, Op), jnp.float32),
        grid=(nb, ntc),
        in_specs=[
            # forward gate inputs: time chunk tc, column half 0 of gi
            pl.BlockSpec((tt, bt, 3 * Hp), lambda b, tc: (tc, b, 0)),
            # backward gate inputs: reversed time chunk, column half 1 of gi
            pl.BlockSpec((tt, bt, 3 * Hp), lambda b, tc: (ntc - 1 - tc, b, 1)),
            pl.BlockSpec((Hp, 3 * Hp), lambda b, tc: (0, 0)),   # w_hh_f
            pl.BlockSpec((1, 3 * Hp), lambda b, tc: (0, 0)),    # b_hh_f
            pl.BlockSpec((Hp, 3 * Hp), lambda b, tc: (0, 0)),   # w_hh_b
            pl.BlockSpec((1, 3 * Hp), lambda b, tc: (0, 0)),    # b_hh_b
            pl.BlockSpec((Hp, Op), lambda b, tc: (0, 0)),       # w_fc_fwd
            pl.BlockSpec((Hp, Op), lambda b, tc: (0, 0)),       # w_fc_bwd
            pl.BlockSpec((1, Op), lambda b, tc: (0, 0)),        # b_fc
        ],
        out_specs=pl.BlockSpec((bt, Op), lambda b, tc: (b, 0)),
        scratch_shapes=[pltpu.VMEM((bt, Hp), jnp.float32),      # h_fwd
                        pltpu.VMEM((bt, Hp), jnp.float32)],     # h_bwd
        compiler_params=pltpu.CompilerParams(
            dimension_semantics=("parallel", "arbitrary"),
            vmem_limit_bytes=_VMEM_LIMIT),
    )(gi, gi, w_hh_f, b_hh_f, w_hh_b, b_hh_b, w_fc_fwd, w_fc_bwd, b_fc)

    return out_full[:, :O]


# ----------------------------------------------------------------------------
# params + pure-JAX reference
# ----------------------------------------------------------------------------
def init_params(key, input_size, hidden_size, output_size):
    H = hidden_size
    k_gru = 1.0 / float(H) ** 0.5
    k_fc = 1.0 / float(2 * H) ** 0.5
    keys = jax.random.split(key, 11)

    def u(k, shape, bound):
        return jax.random.uniform(k, shape, jnp.float32, -bound, bound)

    return {
        "embedding": jax.random.normal(keys[0], (input_size, H), jnp.float32),
        # GRU weights stored transposed: (H, 3H), gate order [r, z, n].
        "w_ih_f": u(keys[1], (H, 3 * H), k_gru),
        "w_hh_f": u(keys[2], (H, 3 * H), k_gru),
        "b_ih_f": u(keys[3], (1, 3 * H), k_gru),
        "b_hh_f": u(keys[4], (1, 3 * H), k_gru),
        "w_ih_b": u(keys[5], (H, 3 * H), k_gru),
        "w_hh_b": u(keys[6], (H, 3 * H), k_gru),
        "b_ih_b": u(keys[7], (1, 3 * H), k_gru),
        "b_hh_b": u(keys[8], (1, 3 * H), k_gru),
        # fc: Linear(2H -> out), stored transposed (2H, out); rows [:H] act on
        # the backward final state (hidden[-1]), rows [H:] on the forward one.
        "w_fc": u(keys[9], (2 * H, output_size), k_fc),
        "b_fc": u(keys[10], (1, output_size), k_fc),
    }


def reference_forward(params, tokens):
    """Pure-JAX reference of the same forward pass (for verification)."""
    H = params["embedding"].shape[1]
    x = params["embedding"][tokens.T]            # (T, B, H)
    T, B, _ = x.shape

    def step(h, x_t, wih, whh, bih, bhh):
        gi = x_t @ wih + bih
        gh = h @ whh + bhh
        r = jax.nn.sigmoid(gi[:, :H] + gh[:, :H])
        z = jax.nn.sigmoid(gi[:, H:2 * H] + gh[:, H:2 * H])
        n = jnp.tanh(gi[:, 2 * H:] + r * gh[:, 2 * H:])
        return (1.0 - z) * n + z * h

    h_f = jnp.zeros((B, H), jnp.float32)
    for t in range(T):
        h_f = step(h_f, x[t], params["w_ih_f"], params["w_hh_f"],
                   params["b_ih_f"], params["b_hh_f"])
    h_b = jnp.zeros((B, H), jnp.float32)
    for t in range(T - 1, -1, -1):
        h_b = step(h_b, x[t], params["w_ih_b"], params["w_hh_b"],
                   params["b_ih_b"], params["b_hh_b"])
    # torch: cat([hidden[-1], hidden[-2]]) = [backward, forward]
    hidden_cat = jnp.concatenate([h_b, h_f], axis=1)
    return hidden_cat @ params["w_fc"] + params["b_fc"]


if __name__ == "__main__":
    INPUT_SIZE = 16     # vocab size
    HIDDEN_SIZE = 32
    OUTPUT_SIZE = 4
    BATCH = 2
    SEQ = 8

    key = jax.random.PRNGKey(0)
    pkey, tkey = jax.random.split(key)
    params = init_params(pkey, INPUT_SIZE, HIDDEN_SIZE, OUTPUT_SIZE)
    tokens = jax.random.randint(tkey, (BATCH, SEQ), 0, INPUT_SIZE, jnp.int32)
    seq_lengths = jnp.full((BATCH,), SEQ, jnp.int32)

    # f32 path so the 1e-5 check holds; pass compute_dtype=jnp.bfloat16 (any
    # generation) for ~2x MXU throughput and half the x/gi/weight HBM traffic.
    out = rnn_classifier_forward(params, tokens, seq_lengths)
    out = jax.block_until_ready(out)

    ref = reference_forward(params, tokens)
    assert out.shape == (BATCH, OUTPUT_SIZE), out.shape
    assert jnp.allclose(out, ref, atol=1e-5, rtol=1e-5), (out, ref)
    print("KERNEL_OK")
</pallas_src>

<mosaic_0001>
module attributes {stable_mosaic.version = 11 : i64} {
  func.func @_input_proj_kernel(%arg0: i32, %arg1: i32, %arg2: memref<16x128xf32, #tpu.memory_space<vmem>>, %arg3: memref<128x768xf32, #tpu.memory_space<vmem>>, %arg4: memref<1x768xf32, #tpu.memory_space<vmem>>, %arg5: memref<16x768xf32, #tpu.memory_space<vmem>>) attributes {dimension_semantics = [#tpu.dimension_semantics<parallel>, #tpu.dimension_semantics<parallel>], iteration_bounds = array<i64: 1, 1>, scalar_prefetch = 0 : i64, scratch_operands = 0 : i64, tpu.core_type = #tpu.core_type<tc>, window_params = [{transform_indices = @transform_0, window_bounds = array<i64: 16, 128>}, {transform_indices = @transform_1, window_bounds = array<i64: 128, 768>}, {transform_indices = @transform_2, window_bounds = array<i64: 1, 768>}, {transform_indices = @transform_3, window_bounds = array<i64: 16, 768>}]} {
    %c0 = arith.constant 0 : index
    %c0_0 = arith.constant 0 : index
    %0 = vector.load %arg2[%c0, %c0_0] : memref<16x128xf32, #tpu.memory_space<vmem>>, vector<16x128xf32>
    %c0_1 = arith.constant 0 : index
    %c0_2 = arith.constant 0 : index
    %1 = vector.load %arg3[%c0_1, %c0_2] : memref<128x768xf32, #tpu.memory_space<vmem>>, vector<128x768xf32>
    %cst = arith.constant dense<0.000000e+00> : vector<16x768xf32>
    %2 = tpu.matmul %0, %1, %cst {dimension_numbers = #tpu.dot_dimension_numbers<[1], [0], [0], [1], [0, 0, 1, 1], [], []>} : vector<16x128xf32>, vector<128x768xf32>, vector<16x768xf32> -> vector<16x768xf32>
    %c0_3 = arith.constant 0 : index
    %c0_4 = arith.constant 0 : index
    %3 = vector.load %arg4[%c0_3, %c0_4] : memref<1x768xf32, #tpu.memory_space<vmem>>, vector<1x768xf32>
    %4 = vector.broadcast %3 : vector<1x768xf32> to vector<16x768xf32>
    %5 = arith.addf %2, %4 : vector<16x768xf32>
    %c0_5 = arith.constant 0 : index
    %c0_6 = arith.constant 0 : index
    %6 = vector.load %arg5[%c0_5, %c0_6] : memref<16x768xf32, #tpu.memory_space<vmem>>, vector<16x768xf32>
    tpu.vector_store %arg5[%c0_5, %c0_6], %5 {strides = array<i32>} : memref<16x768xf32, #tpu.memory_space<vmem>>, vector<16x768xf32>,
    return
  }
  func.func @transform_0(%arg0: i32, %arg1: i32) -> (i32, i32) {
    %c0_i32 = arith.constant 0 : i32
    %c0_i32_0 = arith.constant 0 : i32
    return %arg0, %c0_i32 : i32, i32
  }
  func.func @transform_1(%arg0: i32, %arg1: i32) -> (i32, i32) {
    %c0_i32 = arith.constant 0 : i32
    %c0_i32_0 = arith.constant 0 : i32
    return %c0_i32, %arg1 : i32, i32
  }
  func.func @transform_2(%arg0: i32, %arg1: i32) -> (i32, i32) {
    %c0_i32 = arith.constant 0 : i32
    %c0_i32_0 = arith.constant 0 : i32
    return %c0_i32, %arg1 : i32, i32
  }
  func.func @transform_3(%arg0: i32, %arg1: i32) -> (i32, i32) {
    %c0_i32 = arith.constant 0 : i32
    return %arg0, %arg1 : i32, i32
  }
}

</mosaic_0001>

<bundles_post_ra>
// kernel: tpu_custom_call.1
= control target key start
LH: loop header
LB: loop body
LE: loop exit
PB: predicated region body
PF: predicated region fallthrough
CT: control target
= control target key end

     0   :  { %8 = vsyncpa [#allocation3], 0  ;;  %s715_s0 = inlined_call_operand.hbm [shape: f32[16,128], index: 0, kind: input, shape index: {}]   ;;  %s716_s1 = inlined_call_operand.hbm [shape: f32[128,768], index: 1, kind: input, shape index: {}]   ;;  %s717_s2 = inlined_call_operand.vmem [shape: f32[1,768], index: 2, kind: input, shape index: {}]   ;;  %s718_s3 = inlined_call_operand.hbm [shape: f32[16,768], index: 3, kind: output, shape index: {}]  }
   0x1   :  { %9 = vsyncpa [#allocation6], 0 }
   0x2   :  { %10 = vsyncpa [#allocation4], 0  ;;  %s626_s12 = smov [#allocation2]   ;;  %s554_s16 = scalar_lea.hbm %s715_s0, 256 }
   0x3   :  { %s16_s13 = sshll.u32 %s626_s12, 4  ;;  %p555_p0 = scmp.ne.s32.totalorder %s715_s0, %s554_s16  ;;  %s17_s13 = int_to_ptr.vmem [resolvable:$true] %s16_s13 }
   0x4   :  { %p558_p1 = scmp.lt.u32.totalorder %s554_s16, %s715_s0 }
   0x6   :  { %p560_p2 = pnand %p558_p1, %p555_p0 }
   0x8   :  { %563 = shalt.err (!%p560_p2)
}
   0x9   :  { %s564_s21 = scalar_lea.vmem %s17_s13, 256  ;;  %p569_p4 = scmp.lt.s32.totalorder %s17_s13, %s17_s13 }
   0xa   :  { %p565_p3 = scmp.ne.s32.totalorder %s17_s13, %s564_s21  ;;  %p570_p5 = scmp.lt.s32.totalorder %s564_s21, %s564_s21 }
   0xc   :  { %p571_p6 = por %p570_p5, %p569_p4 }
   0xe   :  { %p572_p7 = pnand %p571_p6, %p565_p3 }
  0x10   :  { %575 = shalt.err (!%p572_p7)
}
  0x11   :  { %s627_s22 = smov 128   ;;  %s628_s23 = smov 8  }
  0x12   :  { %22 = dma.hbm_to_vmem [thread:$0]  %s715_s0, 256, %s17_s13, [#allocation3], %s627_s22, %s627_s22, %s628_s23  }
  0x13   :  { %s629_s26 = smov [#allocation5]   ;;  %s576_s30 = scalar_lea.hbm %s716_s1, 12288 }
  0x14   :  { %s28_s27 = sshll.u32 %s629_s26, 4  ;;  %p577_p8 = scmp.ne.s32.totalorder %s716_s1, %s576_s30  ;;  %s29_s27 = int_to_ptr.vmem [resolvable:$true] %s28_s27 }
  0x15   :  { %p580_p9 = scmp.lt.u32.totalorder %s576_s30, %s716_s1 }
  0x17   :  { %p582_p10 = pnand %p580_p9, %p577_p8 }
  0x19   :  { %585 = shalt.err (!%p582_p10)
}
  0x1a   :  { %s586_s8 = scalar_lea.vmem %s29_s27, 12288  ;;  %p591_p12 = scmp.lt.s32.totalorder %s29_s27, %s29_s27 }
  0x1b   :  { %p587_p11 = scmp.ne.s32.totalorder %s29_s27, %s586_s8  ;;  %p592_p13 = scmp.lt.s32.totalorder %s586_s8, %s586_s8 }
  0x1d   :  { %p593_p0 = por %p592_p13, %p591_p12 }
  0x1f   :  { %p594_p1 = pnand %p593_p0, %p587_p11 }
  0x21   :  { %597 = shalt.err (!%p594_p1)
}
  0x22   :  { %s630_s0 = smov 768   ;;  %s631_s9 = smov 48  }
  0x23   :  { %34 = dma.hbm_to_vmem [thread:$0]  %s716_s1, 12288, %s29_s27, [#allocation6], %s630_s0, %s630_s0, %s631_s9  }
  0x24   :  { %620 = dma.done.wait [#allocation3], 256  }
  0x25   :  { %621 = vsyncadd [#allocation3], 4294967040 }
  0x26   :  { %622 = dma.done.wait [#allocation6], 12288  }
  0x27   :  { %623 = vsyncadd [#allocation6], 4294955008  ;;  %v632_v0 = vmov 0.0   ;;  %v46_v1 = vld [vmem:[#allocation5 + $0x8] sm:$0xff]  ;;  %v52_v2 = vld [vmem:[#allocation5 + $0x38] sm:$0xff] }
  0x28   :  { %237 = vmatprep.mubr.f32.mxu0 %v632_v0  ;;  %314 = vmatprep.mubr.f32.mxu1 %v632_v0  ;;  %v48_v3 = vld [vmem:[#allocation5 + $0x18] sm:$0xff]  ;;  %v434_v4 = vpack.c.bf16 %v52_v2, %v46_v1  ;;  %v54_v5 = vld [vmem:[#allocation5 + $0x48] sm:$0xff]  ;;  %v45_v6 = vld [vmem:[#allocation5] sm:$0xff] }
  0x29   :  { %v51_v7 = vld [vmem:[#allocation5 + $0x30] sm:$0xff]  ;;  %v466_v8 = vpack.c.bf16 %v54_v5, %v48_v3  ;;  %v53_v11 = vld [vmem:[#allocation5 + $0x40] sm:$0xff]  ;;  %v58_v12 = vld [vmem:[#allocation5 + $0x68] sm:$0xff] }
  0x2a   :  { %v436_v9 = vpack.c.bf16 %v51_v7, %v45_v6  ;;  %v47_v10 = vld [vmem:[#allocation5 + $0x10] sm:$0xff]  ;;  %435 = vmatprep.subr.bf16.mxu0 %v434_v4  ;;  %v64_v14 = vld [vmem:[#allocation5 + $0x98] sm:$0xff]  ;;  %v66_v16 = vld [vmem:[#allocation5 + $0xa8] sm:$0xff] }
  0x2b   :  { %v468_v13 = vpack.c.bf16 %v53_v11, %v47_v10  ;;  %v60_v15 = vld [vmem:[#allocation5 + $0x78] sm:$0xff]  ;;  %467 = vmatprep.subr.bf16.mxu1 %v466_v8  ;;  %v438_v17 = vpack.c.bf16 %v64_v14, %v58_v12  ;;  %v57_v19 = vld [vmem:[#allocation5 + $0x60] sm:$0xff]  ;;  %v63_v20 = vld [vmem:[#allocation5 + $0x90] sm:$0xff] }
  0x2c   :  { %437 = vmatpush1.bf16.msra.mxu0 %v436_v9  ;;  %v470_v18 = vpack.c.bf16 %v66_v16, %v60_v15  ;;  %v59_v21 = vld [vmem:[#allocation5 + $0x70] sm:$0xff]  ;;  %v440_v22 = vpack.c.bf16 %v63_v20, %v57_v19  ;;  %v65_v23 = vld [vmem:[#allocation5 + $0xa0] sm:$0xff]  ;;  %v70_v24 = vld [vmem:[#allocation5 + $0xc8] sm:$0xff] }
  0x2d   :  { %469 = vmatpush1.bf16.msra.mxu1 %v468_v13  ;;  %v76_v25 = vld [vmem:[#allocation5 + $0xf8] sm:$0xff]  ;;  %439 = vmatprep.subr.bf16.mxu0 %v438_v17  ;;  %v472_v26 = vpack.c.bf16 %v65_v23, %v59_v21  ;;  %v78_v29 = vld [vmem:[#allocation5 + $0x108] sm:$0xff]  ;;  %v69_v30 = vld [vmem:[#allocation5 + $0xc0] sm:$0xff] }
  0x2e   :  { %471 = vmatprep.subr.bf16.mxu1 %v470_v18  ;;  %v442_v27 = vpack.c.bf16 %v76_v25, %v70_v24  ;;  %v72_v28 = vld [vmem:[#allocation5 + $0xd8] sm:$0xff]  ;;  %v75_v32 = vld [vmem:[#allocation5 + $0xf0] sm:$0xff]  ;;  %v77_v34 = vld [vmem:[#allocation5 + $0x100] sm:$0xff] }
  0x2f   :  { %v474_v31 = vpack.c.bf16 %v78_v29, %v72_v28  ;;  %v71_v33 = vld [vmem:[#allocation5 + $0xd0] sm:$0xff]  ;;  %v444_v35 = vpack.c.bf16 %v75_v32, %v69_v30  ;;  %v82_v36 = vld [vmem:[#allocation5 + $0x128] sm:$0xff]  ;;  %v88_v37 = vld [vmem:[#allocation5 + $0x158] sm:$0xff] }
  0x30   :  { %441 = vmatpush1.bf16.msra.mxu0 %v440_v22  ;;  %v84_v38 = vld [vmem:[#allocation5 + $0x138] sm:$0xff]  ;;  %v476_v39 = vpack.c.bf16 %v77_v34, %v71_v33  ;;  %v446_v40 = vpack.c.bf16 %v88_v37, %v82_v36  ;;  %v90_v41 = vld [vmem:[#allocation5 + $0x168] sm:$0xff]  ;;  %v81_v42 = vld [vmem:[#allocation5 + $0x120] sm:$0xff] }
  0x31   :  { %473 = vmatpush1.bf16.msra.mxu1 %v472_v26  ;;  %443 = vmatprep.subr.bf16.mxu0 %v442_v27  ;;  %v87_v43 = vld [vmem:[#allocation5 + $0x150] sm:$0xff]  ;;  %v478_v44 = vpack.c.bf16 %v90_v41, %v84_v38  ;;  %v89_v46 = vld [vmem:[#allocation5 + $0x160] sm:$0xff]  ;;  %v94_v47 = vld [vmem:[#allocation5 + $0x188] sm:$0xff] }
  0x32   :  { %475 = vmatprep.subr.bf16.mxu1 %v474_v31  ;;  %v83_v45 = vld [vmem:[#allocation5 + $0x130] sm:$0xff]  ;;  %v100_v48 = vld [vmem:[#allocation5 + $0x1b8] sm:$0xff]  ;;  %v102_v50 = vld [vmem:[#allocation5 + $0x1c8] sm:$0xff]  ;;  %v448_v51 = vpack.c.bf16 %v87_v43, %v81_v42 }
  0x33   :  { %v96_v49 = vld [vmem:[#allocation5 + $0x198] sm:$0xff]  ;;  %v480_v52 = vpack.c.bf16 %v89_v46, %v83_v45  ;;  %v450_v53 = vpack.c.bf16 %v100_v48, %v94_v47  ;;  %v93_v54 = vld [vmem:[#allocation5 + $0x180] sm:$0xff]  ;;  %v99_v55 = vld [vmem:[#allocation5 + $0x1b0] sm:$0xff] }
  0x34   :  { %445 = vmatpush1.bf16.msra.mxu0 %v444_v35  ;;  %v95_v56 = vld [vmem:[#allocation5 + $0x190] sm:$0xff]  ;;  %v482_v57 = vpack.c.bf16 %v102_v50, %v96_v49  ;;  %v101_v58 = vld [vmem:[#allocation5 + $0x1c0] sm:$0xff]  ;;  %v106_v59 = vld [vmem:[#allocation5 + $0x1e8] sm:$0xff]  ;;  %v452_v63 = vpack.c.bf16 %v99_v55, %v93_v54 }
  0x35   :  { %477 = vmatpush1.bf16.msra.mxu1 %v476_v39  ;;  %447 = vmatprep.subr.bf16.mxu0 %v446_v40  ;;  %v112_v60 = vld [vmem:[#allocation5 + $0x218] sm:$0xff]  ;;  %v114_v62 = vld [vmem:[#allocation5 + $0x228] sm:$0xff]  ;;  %v484_v1 = vpack.c.bf16 %v101_v58, %v95_v56  ;;  %v105_v3 = vld [vmem:[#allocation5 + $0x1e0] sm:$0xff] }
  0x36   :  { %479 = vmatprep.subr.bf16.mxu1 %v478_v44  ;;  %v108_v61 = vld [vmem:[#allocation5 + $0x1f8] sm:$0xff]  ;;  %v454_v2 = vpack.c.bf16 %v112_v60, %v106_v59  ;;  %v111_v4 = vld [vmem:[#allocation5 + $0x210] sm:$0xff]  ;;  %v113_v7 = vld [vmem:[#allocation5 + $0x220] sm:$0xff] }
  0x37   :  { %v107_v5 = vld [vmem:[#allocation5 + $0x1f0] sm:$0xff]  ;;  %v486_v6 = vpack.c.bf16 %v114_v62, %v108_v61  ;;  %v118_v8 = vld [vmem:[#allocation5 + $0x248] sm:$0xff]  ;;  %v124_v9 = vld [vmem:[#allocation5 + $0x278] sm:$0xff]  ;;  %v456_v12 = vpack.c.bf16 %v111_v4, %v105_v3 }
  0x38   :  { %449 = vmatpush1.bf16.msra.mxu0 %v448_v51  ;;  %v120_v10 = vld [vmem:[#allocation5 + $0x258] sm:$0xff]  ;;  %v126_v11 = vld [vmem:[#allocation5 + $0x288] sm:$0xff]  ;;  %v488_v13 = vpack.c.bf16 %v113_v7, %v107_v5  ;;  %v458_v14 = vpack.c.bf16 %v124_v9, %v118_v8  ;;  %v117_v15 = vld [vmem:[#allocation5 + $0x240] sm:$0xff] }
  0x39   :  { %481 = vmatpush1.bf16.msra.mxu1 %v480_v52  ;;  %451 = vmatprep.subr.bf16.mxu0 %v450_v53  ;;  %v123_v16 = vld [vmem:[#allocation5 + $0x270] sm:$0xff]  ;;  %v490_v18 = vpack.c.bf16 %v126_v11, %v120_v10  ;;  %v125_v19 = vld [vmem:[#allocation5 + $0x280] sm:$0xff]  ;;  %v130_v20 = vld [vmem:[#allocation5 + $0x2a8] sm:$0xff] }
  0x3a   :  { %483 = vmatprep.subr.bf16.mxu1 %v482_v57  ;;  %v119_v17 = vld [vmem:[#allocation5 + $0x250] sm:$0xff]  ;;  %v136_v21 = vld [vmem:[#allocation5 + $0x2d8] sm:$0xff]  ;;  %v138_v23 = vld [vmem:[#allocation5 + $0x2e8] sm:$0xff]  ;;  %v460_v24 = vpack.c.bf16 %v123_v16, %v117_v15 }
  0x3b   :  { %v132_v22 = vld [vmem:[#allocation5 + $0x2b8] sm:$0xff]  ;;  %v492_v25 = vpack.c.bf16 %v125_v19, %v119_v17  ;;  %v462_v26 = vpack.c.bf16 %v136_v21, %v130_v20  ;;  %v129_v27 = vld [vmem:[#allocation5 + $0x2a0] sm:$0xff]  ;;  %v135_v28 = vld [vmem:[#allocation5 + $0x2d0] sm:$0xff]  ;;  %v143_v20 = vlaneseq }
  0x3c   :  { %453 = vmatpush1.bf16.msra.mxu0 %v452_v63  ;;  %v131_v29 = vld [vmem:[#allocation5 + $0x2b0] sm:$0xff]  ;;  %v494_v30 = vpack.c.bf16 %v138_v23, %v132_v22  ;;  %v137_v31 = vld [vmem:[#allocation5 + $0x2e0] sm:$0xff]  ;;  %v50_v32 = vld [vmem:[#allocation5 + $0x28] sm:$0xff]  ;;  %v464_v34 = vpack.c.bf16 %v135_v28, %v129_v27 }
  0x3d   :  { %485 = vmatpush1.bf16.msra.mxu1 %v484_v1  ;;  %455 = vmatprep.subr.bf16.mxu0 %v454_v2  ;;  %v56_v33 = vld [vmem:[#allocation5 + $0x58] sm:$0xff]  ;;  %v496_v35 = vpack.c.bf16 %v137_v31, %v131_v29  ;;  %v49_v37 = vld [vmem:[#allocation5 + $0x20] sm:$0xff]  ;;  %v55_v38 = vld [vmem:[#allocation5 + $0x50] sm:$0xff]  ;;  %v144_v21 = vshrl.u32 %v143_v20, 7 }
  0x3e   :  { %487 = vmatprep.subr.bf16.mxu1 %v486_v6  ;;  %v498_v36 = vpack.c.bf16 %v56_v33, %v50_v32  ;;  %v62_v39 = vld [vmem:[#allocation5 + $0x88] sm:$0xff]  ;;  %v68_v40 = vld [vmem:[#allocation5 + $0xb8] sm:$0xff]  ;;  %v683_v41 = vld [vmem:[#allocation2] sm:$0xff]  ;;  %v500_v42 = vpack.c.bf16 %v55_v38, %v49_v37 }
  0x3f   :  { %v502_v43 = vpack.c.bf16 %v68_v40, %v62_v39  ;;  %v61_v44 = vld [vmem:[#allocation5 + $0x80] sm:$0xff]  ;;  %v67_v45 = vld [vmem:[#allocation5 + $0xb0] sm:$0xff]  ;;  %v74_v46 = vld [vmem:[#allocation5 + $0xe8] sm:$0xff]  ;;  %v145_v22 = vsub.s32 0, %v144_v21 }
  0x40   :  { %457 = vmatpush1.bf16.msra.mxu0 %v456_v12  ;;  %v80_v47 = vld [vmem:[#allocation5 + $0x118] sm:$0xff]  ;;  %v504_v48 = vpack.c.bf16 %v67_v45, %v61_v44  ;;  %v73_v51 = vld [vmem:[#allocation5 + $0xe0] sm:$0xff]  ;;  %v79_v52 = vld [vmem:[#allocation5 + $0x110] sm:$0xff] }
  0x41   :  { %489 = vmatpush1.bf16.msra.mxu1 %v488_v13  ;;  %459 = vmatprep.subr.bf16.mxu0 %v458_v14  ;;  %v687_v49 = vld [vmem:[#allocation2 + $0x8] sm:$0xff]  ;;  %v506_v50 = vpack.c.bf16 %v80_v47, %v74_v46  ;;  %v86_v53 = vld [vmem:[#allocation5 + $0x148] sm:$0xff]  ;;  %v508_v55 = vpack.c.bf16 %v79_v52, %v73_v51  ;;  %v85_v57 = vld [vmem:[#allocation5 + $0x140] sm:$0xff]  ;;  %v161_v47 = vsub.s32 4, %v144_v21 }
  0x42   :  { %491 = vmatprep.subr.bf16.mxu1 %v490_v18  ;;  %v92_v54 = vld [vmem:[#allocation5 + $0x178] sm:$0xff]  ;;  %v91_v58 = vld [vmem:[#allocation5 + $0x170] sm:$0xff]  ;;  %v98_v59 = vld [vmem:[#allocation5 + $0x1a8] sm:$0xff] }
  0x43   :  { %v510_v56 = vpack.c.bf16 %v92_v54, %v86_v53  ;;  %v104_v60 = vld [vmem:[#allocation5 + $0x1d8] sm:$0xff]  ;;  %v512_v61 = vpack.c.bf16 %v91_v58, %v85_v57  ;;  %v97_v63 = vld [vmem:[#allocation5 + $0x1a0] sm:$0xff]  ;;  %v103_v1 = vld [vmem:[#allocation5 + $0x1d0] sm:$0xff] }
  0x44   :  { %461 = vmatpush1.bf16.msra.mxu0 %v460_v24  ;;  %v514_v62 = vpack.c.bf16 %v104_v60, %v98_v59  ;;  %v110_v2 = vld [vmem:[#allocation5 + $0x208] sm:$0xff]  ;;  %v116_v3 = vld [vmem:[#allocation5 + $0x238] sm:$0xff]  ;;  %v516_v4 = vpack.c.bf16 %v103_v1, %v97_v63  ;;  %v109_v6 = vld [vmem:[#allocation5 + $0x200] sm:$0xff]  ;;  %v153_v24 = vsub.s32 2, %v144_v21 }
  0x45   :  { %493 = vmatpush1.bf16.msra.mxu1 %v492_v25  ;;  %463 = vmatprep.subr.bf16.mxu0 %v462_v26  ;;  %v518_v5 = vpack.c.bf16 %v116_v3, %v110_v2  ;;  %v115_v7 = vld [vmem:[#allocation5 + $0x230] sm:$0xff]  ;;  %v122_v8 = vld [vmem:[#allocation5 + $0x268] sm:$0xff]  ;;  %v121_v11 = vld [vmem:[#allocation5 + $0x260] sm:$0xff]  ;;  %v149_v25 = vsub.s32 1, %v144_v21  ;;  %v157_v26 = vsub.s32 3, %v144_v21 }
  0x46   :  { %495 = vmatprep.subr.bf16.mxu1 %v494_v30  ;;  %v520_v9 = vpack.c.bf16 %v115_v7, %v109_v6  ;;  %v127_v12 = vld [vmem:[#allocation5 + $0x290] sm:$0xff]  ;;  %v134_v13 = vld [vmem:[#allocation5 + $0x2c8] sm:$0xff]  ;;  %v140_v14 = vld [vmem:[#allocation5 + $0x2f8] sm:$0xff] }
  0x47   :  { %v524_v15 = vpack.c.bf16 %v127_v12, %v121_v11  ;;  %v526_v16 = vpack.c.bf16 %v140_v14, %v134_v13  ;;  %v133_v17 = vld [vmem:[#allocation5 + $0x2c0] sm:$0xff]  ;;  %v139_v18 = vld [vmem:[#allocation5 + $0x2f0] sm:$0xff] }
  0x48   :  { %465 = vmatpush1.bf16.msra.mxu0 %v464_v34  ;;  %v528_v19 = vpack.c.bf16 %v139_v18, %v133_v17  ;;  %v141_v23 = vld [vmem:[%s717_s2] sm:$0x3f]  ;;  %s633_s2 = smov [#allocation7]  }
  0x49   :  { %497 = vmatpush1.bf16.msra.mxu1 %v496_v35  ;;  %499 = vmatprep.subr.bf16.mxu0 %v498_v36  ;;  %v146_v27 = vrot.slane %v141_v23, %v145_v22  ;;  %v154_v28 = vrot.slane %v141_v23, %v153_v24  ;;  %v150_v29 = vrot.slane %v141_v23, %v149_v25  ;;  %s421_s13 = sshll.u32 %s633_s2, 4  ;;  %s422_s13 = int_to_ptr.vmem [resolvable:$true] %s421_s13 }
  0x4a   :  { %530 = vmatprep.subr.bf16.mxu1 %v498_v36  ;;  %v158_v30 = vrot.slane %v141_v23, %v157_v26  ;;  %s598_s14 = scalar_lea.vmem %s422_s13, 1536  ;;  %p603_p3 = scmp.lt.s32.totalorder %s422_s13, %s422_s13 }
  0x4b   :  { %238 = vmatmul.mubr.f32.vlgmr.msra.gmra.mrb[0].mxu0 %v683_v41  ;;  %p599_p2 = scmp.ne.s32.totalorder %s422_s13, %s598_s14  ;;  %p604_p4 = scmp.lt.s32.totalorder %s598_s14, %s598_s14 }
  0x4c   :  { %315 = vmatmul.mubr.f32.vlgmr.msra.gmra.mrb[0].mxu1 %v683_v41  ;;  %501 = vmatpush1.bf16.msra.mxu0 %v500_v42 }
  0x4d   :  { %538 = vmatpush1.bf16.msra.mxu1 %v500_v42  ;;  %503 = vmatprep.subr.bf16.mxu0 %v502_v43  ;;  %p605_p5 = por %p604_p4, %p603_p3 }
  0x4e   :  { %531 = vmatprep.subr.bf16.mxu1 %v502_v43  ;;  %243 = vmatprep.mubr.f32.mxu0 %v632_v0 }
  0x4f   :  { %320 = vmatprep.mubr.f32.mxu1 %v632_v0  ;;  %244 = vmatmul.mubr.f32.gmra.mrb[2].mxu0 %v687_v49  ;;  %p606_p6 = pnand %p605_p5, %p599_p2 }
  0x50   :  { %505 = vmatpush1.bf16.msra.mxu0 %v504_v48  ;;  %321 = vmatmul.mubr.f32.gmra.mrb[2].mxu1 %v687_v49 }
  0x51   :  { %539 = vmatpush1.bf16.msra.mxu1 %v504_v48  ;;  %507 = vmatprep.subr.bf16.mxu0 %v506_v50  ;;  %v165_v48 = vsub.s32 5, %v144_v21 }
  0x52   :  { %532 = vmatprep.subr.bf16.mxu1 %v506_v50  ;;  %391 = vmatprep.mubr.f32.mxu0 %v632_v0 }
  0x53   :  { %397 = vmatprep.mubr.f32.mxu1 %v632_v0  ;;  %v128_v0 = vld [vmem:[#allocation5 + $0x298] sm:$0xff]  ;;  %v166_v50 = vrot.slane %v141_v23, %v165_v48 }
  0x54   :  { %509 = vmatpush1.bf16.msra.mxu0 %v508_v55  ;;  %v522_v10 = vpack.c.bf16 %v128_v0, %v122_v8 }
  0x55   :  { %540 = vmatpush1.bf16.msra.mxu1 %v508_v55  ;;  %511 = vmatprep.subr.bf16.mxu0 %v510_v56 }
  0x56   :  { %533 = vmatprep.subr.bf16.mxu1 %v510_v56 }
  0x58   :  { %513 = vmatpush1.bf16.msra.mxu0 %v512_v61 }
  0x59   :  { %541 = vmatpush1.bf16.msra.mxu1 %v512_v61  ;;  %515 = vmatprep.subr.bf16.mxu0 %v514_v62 }
  0x5a   :  { %534 = vmatprep.subr.bf16.mxu1 %v514_v62 }
  0x5c   :  { %517 = vmatpush1.bf16.msra.mxu0 %v516_v4 }
  0x5d   :  { %542 = vmatpush1.bf16.msra.mxu1 %v516_v4  ;;  %519 = vmatprep.subr.bf16.mxu0 %v518_v5 }
  0x5e   :  { %535 = vmatprep.subr.bf16.mxu1 %v518_v5 }
  0x60   :  { %521 = vmatpush1.bf16.msra.mxu0 %v520_v9 }
  0x61   :  { %543 = vmatpush1.bf16.msra.mxu1 %v520_v9  ;;  %523 = vmatprep.subr.bf16.mxu0 %v522_v10 }
  0x62   :  { %536 = vmatprep.subr.bf16.mxu1 %v522_v10 }
  0x64   :  { %525 = vmatpush1.bf16.msra.mxu0 %v524_v15 }
  0x65   :  { %544 = vmatpush1.bf16.msra.mxu1 %v524_v15  ;;  %527 = vmatprep.subr.bf16.mxu0 %v526_v16 }
  0x66   :  { %537 = vmatprep.subr.bf16.mxu1 %v526_v16 }
  0x68   :  { %529 = vmatpush1.bf16.msra.mxu0 %v528_v19 }
  0x69   :  { %545 = vmatpush1.bf16.msra.mxu1 %v528_v19 }
  0x6b   :  { %392 = vmatmul.mubr.f32.vlgmr.msra.gmra.mrb[4].mxu0 %v683_v41 }
  0x6c   :  { %398 = vmatmul.mubr.f32.vlgmr.msra.gmra.mrb[4].mxu1 %v687_v49  ;;  %v162_v49 = vrot.slane %v141_v23, %v161_v47 }
 0x11e   :  { %v239_v31 = vpop.f32.mrb[0].mxu0 }
 0x11f   :  { %v240_v32 = vadd.f32 %v239_v31, %v146_v27  ;;  %v316_v33 = vpop.f32.mrb[0].mxu1  ;;  %v241_v34 = vpop.f32.mrb[1].mxu0 }
 0x120   :  { %v317_v35 = vadd.f32 %v316_v33, %v154_v28  ;;  %v242_v36 = vadd.f32 %v241_v34, %v150_v29  ;;  %v318_v37 = vpop.f32.mrb[1].mxu1 }
 0x121   :  { %404 = vst [vmem:[#allocation7] sm:$0xff] %v240_v32  ;;  %v319_v38 = vadd.f32 %v318_v37, %v158_v30 }
 0x122   :  { %406 = vst [vmem:[#allocation7 + $0x10] sm:$0xff] %v317_v35  ;;  %405 = vst [vmem:[#allocation7 + $0x8] sm:$0xff] %v242_v36  ;;  %v245_v39 = vpop.f32.mrb[2].mxu0 }
 0x123   :  { %407 = vst [vmem:[#allocation7 + $0x18] sm:$0xff] %v319_v38  ;;  %v246_v40 = vadd.f32 %v245_v39, %v146_v27  ;;  %v322_v41 = vpop.f32.mrb[2].mxu1  ;;  %v247_v42 = vpop.f32.mrb[3].mxu0 }
 0x124   :  { %v323_v43 = vadd.f32 %v322_v41, %v154_v28  ;;  %v248_v44 = vadd.f32 %v247_v42, %v150_v29  ;;  %v324_v45 = vpop.f32.mrb[3].mxu1 }
 0x125   :  { %410 = vst [vmem:[#allocation7 + $0x30] sm:$0xff] %v246_v40  ;;  %v325_v46 = vadd.f32 %v324_v45, %v158_v30 }
 0x126   :  { %412 = vst [vmem:[#allocation7 + $0x40] sm:$0xff] %v323_v43  ;;  %411 = vst [vmem:[#allocation7 + $0x38] sm:$0xff] %v248_v44 }
 0x127   :  { %413 = vst [vmem:[#allocation7 + $0x48] sm:$0xff] %v325_v46 }
 0x13e   :  { %v393_v51 = vpop.f32.mrb[4].mxu0 }
 0x13f   :  { %v394_v52 = vadd.f32 %v393_v51, %v162_v49  ;;  %v399_v53 = vpop.f32.mrb[4].mxu1  ;;  %v395_v54 = vpop.f32.mrb[5].mxu0 }
 0x140   :  { %v400_v55 = vadd.f32 %v399_v53, %v162_v49  ;;  %v396_v56 = vadd.f32 %v395_v54, %v166_v50  ;;  %v401_v57 = vpop.f32.mrb[5].mxu1 }
 0x141   :  { %408 = vst [vmem:[#allocation7 + $0x20] sm:$0xff] %v394_v52  ;;  %v402_v58 = vadd.f32 %v401_v57, %v166_v50 }
 0x142   :  { %414 = vst [vmem:[#allocation7 + $0x50] sm:$0xff] %v400_v55  ;;  %409 = vst [vmem:[#allocation7 + $0x28] sm:$0xff] %v396_v56 }
 0x143   :  { %415 = vst [vmem:[#allocation7 + $0x58] sm:$0xff] %v402_v58 }
 0x144   :  { %609 = shalt.err (!%p606_p6)
}
 0x145   :  { %s610_s17 = scalar_lea.hbm %s718_s3, 1536 }
 0x146   :  { %p611_p7 = scmp.ne.s32.totalorder %s718_s3, %s610_s17  ;;  %p614_p8 = scmp.lt.u32.totalorder %s610_s17, %s718_s3 }
 0x148   :  { %p616_p9 = pnand %p614_p8, %p611_p7 }
 0x14a   :  { %619 = shalt.err (!%p616_p9)
}
 0x14b   :  { %427 = dma.vmem_to_hbm [thread:$0]  %s422_s13, 1536, %s718_s3, [#allocation4], %s630_s0, %s630_s0, %s631_s9  }
 0x14c   :  { %624 = dma.done.wait [#allocation4], 1536  }
 0x14d   :  { %625 = vsyncadd [#allocation4], 4294965760 }
 0x14e   :  { %431 = vsyncpa [#allocation3], 1 }
 0x14f   :  { %432 = vsyncpa [#allocation6], 1 }
 0x150   :  { %433 = vsyncpa [#allocation4], 1 }

</bundles_post_ra>
